<compile_context>
chip_gen: v5e
topology: v5e:2x2
jax: 0.10.0
libtpu: 0.0.40
codegen_flags: <defaults>
</compile_context>

<pallas_src>
import functools

import jax
import jax.numpy as jnp
from jax.experimental import pallas as pl
from jax.experimental.pallas import tpu as pltpu


def channel_attention_kernel(x_ref, w1t_ref, w2t_ref, o_ref,
                             sum_acc, max_acc, *, hw_total, tile_hw, tb):
    # x_ref   : (TB, C, tile_hw)  one (batch-tile, hw-tile) block
    # w1t_ref : (C, Ch)           fc1 weight, pre-transposed  (Ch = C // 16)
    # w2t_ref : (Ch, C)           fc2 weight, pre-transposed
    # o_ref   : (TB, 1, C)        lane-dense output rows (written at k == last)
    # sum_acc : (TB, C, 1) f32    running sum   (VMEM scratch)
    # max_acc : (TB, C, 1) f32    running max   (VMEM scratch)
    k = pl.program_id(1)
    nk = pl.num_programs(1)

    @pl.when(k == 0)
    def _init():
        sum_acc[...] = jnp.zeros_like(sum_acc)
        max_acc[...] = jnp.full_like(max_acc, -jnp.inf)

    xf = x_ref[...].astype(jnp.float32)                    # (TB, C, tile_hw)

    def _accumulate(x_sum, x_max):
        # Per-tile XLU reductions -> tiny accumulators (few vregs of traffic).
        sum_acc[...] = sum_acc[...] + jnp.sum(x_sum, axis=-1, keepdims=True)
        max_acc[...] = jnp.maximum(max_acc[...],
                                   jnp.max(x_max, axis=-1, keepdims=True))

    rem = hw_total % tile_hw
    if rem == 0:
        _accumulate(xf, xf)
    else:
        # Unmasked fast path for all full tiles; masking only on the last tile.
        @pl.when(k < nk - 1)
        def _full_tile():
            _accumulate(xf, xf)

        @pl.when(k == nk - 1)
        def _partial_tile():
            lane = jax.lax.broadcasted_iota(jnp.int32, xf.shape, xf.ndim - 1)
            valid = lane < rem
            _accumulate(jnp.where(valid, xf, 0.0),
                        jnp.where(valid, xf, -jnp.inf))

    # --- finalize: tiny MLP + sigmoid, once per batch block -----------------
    @pl.when(k == nk - 1)
    def _finalize():
        s = sum_acc[...]                                   # (TB, C, 1)
        m = max_acc[...]                                   # (TB, C, 1)
        avg = s[..., 0] * (1.0 / hw_total)                 # (TB, C)
        mx = m[..., 0]                                     # (TB, C)
        pooled = jnp.concatenate([avg, mx], axis=0)        # (2*TB, C)

        w1t = w1t_ref[...].astype(jnp.float32)             # (C, Ch)
        w2t = w2t_ref[...].astype(jnp.float32)             # (Ch, C)

        h = jnp.dot(pooled, w1t, preferred_element_type=jnp.float32)  # (2TB, Ch)
        h = jnp.maximum(h, 0.0)                                        # ReLU
        y = jnp.dot(h, w2t, preferred_element_type=jnp.float32)        # (2TB, C)

        out = jax.nn.sigmoid(y[:tb] + y[tb:])              # (TB, C)
        o_ref[...] = out[:, None, :].astype(o_ref.dtype)   # (TB, 1, C)


def _choose_tiles(B, C, HW, itemsize, target_block_bytes):
    """Byte-based tile selection: ~target_block_bytes per input block.

    Returns (tile_hw, tb).  tile_hw is HW (full) or a multiple of 128; tb is a
    divisor of B so the grid stays rectangular.
    """
    per_batch_bytes = C * HW * itemsize
    if per_batch_bytes <= target_block_bytes:
        tile_hw = HW
        tb = 1
        for d in range(1, B + 1):
            if B % d == 0 and d * per_batch_bytes <= target_block_bytes:
                tb = d
        return tile_hw, tb
    # One batch element per step; pick a lane-dense HW tile close to the target.
    tile_hw = (target_block_bytes // (C * itemsize)) // 128 * 128
    tile_hw = int(max(tile_hw, 128))
    tile_hw = min(tile_hw, HW)
    return tile_hw, 1


def channel_attention(x_nchw, w1, w2, *, tile_hw=None, batch_tile=None,
                      target_block_bytes=2 << 20):
    """x_nchw: (B, C, H, W); w1: (C//16, C); w2: (C, C//16). Returns (B, C, 1, 1)."""
    B, C, H, W = x_nchw.shape
    Ch = w1.shape[0]
    HW = H * W
    itemsize = jnp.dtype(x_nchw.dtype).itemsize

    auto_tile_hw, auto_tb = _choose_tiles(B, C, HW, itemsize, target_block_bytes)
    if tile_hw is None:
        tile_hw = auto_tile_hw
    tile_hw = min(tile_hw, HW)
    if tile_hw != HW and tile_hw % 128 != 0:
        raise ValueError("tile_hw must be a multiple of 128 or equal to H*W")

    if batch_tile is None:
        tb = auto_tb if tile_hw == HW else 1
    else:
        tb = batch_tile
    tb = max(int(tb), 1)
    if B % tb != 0:
        raise ValueError("batch_tile must divide the batch size")

    num_k = pl.cdiv(HW, tile_hw)

    x_flat = x_nchw.reshape(B, C, HW)
    w1t = w1.T  # (C, Ch)
    w2t = w2.T  # (Ch, C)
    w_itemsize = jnp.dtype(w1.dtype).itemsize

    # --- VMEM budget (footprint-based, safe on v5e's 16 MiB default scoped and
    # v7x's 64 MiB physical) ---------------------------------------------------
    in_block_bytes = tb * C * tile_hw * itemsize
    w_bytes = 2 * C * Ch * w_itemsize
    out_block_bytes = tb * 8 * max(C, 128) * itemsize          # padded estimate
    acc_bytes = 2 * tb * C * 128 * 4                           # lane-padded (TB,C,1) f32
    footprint = 2 * in_block_bytes + 2 * w_bytes + 2 * out_block_bytes + acc_bytes
    vmem_limit = int(min(max(2 * footprint + (4 << 20), 16 << 20), 48 << 20))

    cost = pl.CostEstimate(
        flops=B * (2 * C * HW + 2 * 2 * Ch * C * 2),           # reductions + 2 tiny matmuls
        transcendentals=B * C,                                 # sigmoid
        bytes_accessed=B * C * HW * itemsize + 2 * C * Ch * w_itemsize + B * C * itemsize,
    )

    kernel = functools.partial(channel_attention_kernel,
                               hw_total=HW, tile_hw=tile_hw, tb=tb)

    out = pl.pallas_call(
        kernel,
        out_shape=jax.ShapeDtypeStruct((B, 1, C), x_nchw.dtype),
        grid_spec=pltpu.PrefetchScalarGridSpec(
            num_scalar_prefetch=0,
            grid=(B // tb, num_k),
            in_specs=[
                pl.BlockSpec((tb, C, tile_hw), lambda b, k: (b, 0, k)),
                pl.BlockSpec((C, Ch), lambda b, k: (0, 0)),
                pl.BlockSpec((Ch, C), lambda b, k: (0, 0)),
            ],
            out_specs=pl.BlockSpec((tb, 1, C), lambda b, k: (b, 0, 0)),
            scratch_shapes=[
                pltpu.VMEM((tb, C, 1), jnp.float32),   # running sum (f32)
                pltpu.VMEM((tb, C, 1), jnp.float32),   # running max (f32)
            ],
        ),
        compiler_params=pltpu.CompilerParams(
            dimension_semantics=("parallel", "arbitrary"),
            vmem_limit_bytes=vmem_limit),
        cost_estimate=cost,
    )(x_flat, w1t, w2t)

    return out.reshape(B, C, 1, 1)


def reference_channel_attention(x, w1, w2):
    # Pure-JAX reference matching the PyTorch forward.
    avg = jnp.mean(x, axis=(2, 3))                        # (B, C)
    mx = jnp.max(x, axis=(2, 3))                          # (B, C)

    def mlp(v):                                           # v: (B, C)
        h = jnp.maximum(v @ w1.T, 0.0)                    # (B, C//16)
        return h @ w2.T                                   # (B, C)

    out = jax.nn.sigmoid(mlp(avg) + mlp(mx))              # (B, C)
    return out[:, :, None, None]


if __name__ == "__main__":
    key = jax.random.PRNGKey(0)
    k_x, k_w1, k_w2, k_x2 = jax.random.split(key, 4)

    # in_planes must be >= 16 for in_planes // 16 to be non-degenerate.
    B, C, H, W = 2, 64, 16, 16
    Ch = C // 16

    x = jax.random.normal(k_x, (B, C, H, W), dtype=jnp.float32)
    # Deterministic synthetic Conv2d(1x1, bias=False) weights (squeezed to 2-D).
    w1 = jax.random.normal(k_w1, (Ch, C), dtype=jnp.float32) * 0.1
    w2 = jax.random.normal(k_w2, (C, Ch), dtype=jnp.float32) * 0.1

    y_ref = reference_channel_attention(x, w1, w2)

    # Case 1: auto tiling -> full HW per step + multi-batch block (TB = 2).
    y = jax.block_until_ready(channel_attention(x, w1, w2))
    assert y.shape == (B, C, 1, 1)
    assert jnp.allclose(y, y_ref, atol=1e-5, rtol=1e-5), "mismatch (auto tiling)"

    # Case 2: forced 128-lane tiles, HW divisible -> multi-tile reduction path.
    y_t = jax.block_until_ready(channel_attention(x, w1, w2, tile_hw=128))
    assert jnp.allclose(y_t, y_ref, atol=1e-5, rtol=1e-5), "mismatch (tiled)"

    # Case 3: HW not a multiple of the tile -> gated remainder-tile masking.
    H2, W2 = 9, 20  # HW = 180
    x2 = jax.random.normal(k_x2, (B, C, H2, W2), dtype=jnp.float32)
    y2 = jax.block_until_ready(channel_attention(x2, w1, w2, tile_hw=128))
    y2_ref = reference_channel_attention(x2, w1, w2)
    assert jnp.allclose(y2, y2_ref, atol=1e-5, rtol=1e-5), "mismatch (ragged)"

    print("KERNEL_OK")
</pallas_src>

<mosaic_0001>
module attributes {stable_mosaic.version = 11 : i64} {
  func.func @channel_attention_kernel(%arg0: i32, %arg1: i32, %arg2: memref<2x64x256xf32, #tpu.memory_space<vmem>>, %arg3: memref<64x4xf32, #tpu.memory_space<vmem>>, %arg4: memref<4x64xf32, #tpu.memory_space<vmem>>, %arg5: memref<2x1x64xf32, #tpu.memory_space<vmem>>, %arg6: memref<2x64x1xf32, #tpu.memory_space<vmem>>, %arg7: memref<2x64x1xf32, #tpu.memory_space<vmem>>) attributes {dimension_semantics = [#tpu.dimension_semantics<parallel>, #tpu.dimension_semantics<arbitrary>], iteration_bounds = array<i64: 1, 1>, scalar_prefetch = 0 : i64, scratch_operands = 2 : i64, tpu.core_type = #tpu.core_type<tc>, window_params = [{transform_indices = @transform_0, window_bounds = array<i64: 2, 64, 256>}, {pipeline_mode = #tpu.pipeline_mode<synchronous>, transform_indices = @transform_1, window_bounds = array<i64: 64, 4>}, {pipeline_mode = #tpu.pipeline_mode<synchronous>, transform_indices = @transform_2, window_bounds = array<i64: 4, 64>}, {transform_indices = @transform_3, window_bounds = array<i64: 2, 1, 64>}]} {
    %c0_i32 = arith.constant 0 : i32
    %0 = arith.cmpi eq, %arg1, %c0_i32 : i32
    %1 = arith.extui %0 : i1 to i32
    %c0_i32_0 = arith.constant 0 : i32
    %2 = arith.cmpi ne, %1, %c0_i32_0 : i32
    scf.if %2 {
      %cst_18 = arith.constant 0.000000e+00 : f32
      %17 = vector.broadcast %cst_18 : f32 to vector<2x64x1xf32>
      %c0_19 = arith.constant 0 : index
      %c0_20 = arith.constant 0 : index
      %c0_21 = arith.constant 0 : index
      %18 = vector.load %arg6[%c0_19, %c0_20, %c0_21] : memref<2x64x1xf32, #tpu.memory_space<vmem>>, vector<2x64x1xf32>
      tpu.vector_store %arg6[%c0_19, %c0_20, %c0_21], %17 {strides = array<i32>} : memref<2x64x1xf32, #tpu.memory_space<vmem>>, vector<2x64x1xf32>,
      %cst_22 = arith.constant 0xFF800000 : f32
      %19 = vector.broadcast %cst_22 : f32 to vector<2x64x1xf32>
      %c0_23 = arith.constant 0 : index
      %c0_24 = arith.constant 0 : index
      %c0_25 = arith.constant 0 : index
      %20 = vector.load %arg7[%c0_23, %c0_24, %c0_25] : memref<2x64x1xf32, #tpu.memory_space<vmem>>, vector<2x64x1xf32>
      tpu.vector_store %arg7[%c0_23, %c0_24, %c0_25], %19 {strides = array<i32>} : memref<2x64x1xf32, #tpu.memory_space<vmem>>, vector<2x64x1xf32>,
    } else {
    }
    %c0 = arith.constant 0 : index
    %c0_1 = arith.constant 0 : index
    %c0_2 = arith.constant 0 : index
    %3 = vector.load %arg2[%c0, %c0_1, %c0_2] : memref<2x64x256xf32, #tpu.memory_space<vmem>>, vector<2x64x256xf32>
    %c0_3 = arith.constant 0 : index
    %c0_4 = arith.constant 0 : index
    %c0_5 = arith.constant 0 : index
    %4 = vector.load %arg6[%c0_3, %c0_4, %c0_5] : memref<2x64x1xf32, #tpu.memory_space<vmem>>, vector<2x64x1xf32>
    %cst = arith.constant dense<0.000000e+00> : vector<2x64xf32>
    %5 = vector.multi_reduction <add>, %3, %cst [2] : vector<2x64x256xf32> to vector<2x64xf32>
    %6 = vector.shape_cast %5 : vector<2x64xf32> to vector<2x64x1xf32>
    %7 = arith.addf %4, %6 : vector<2x64x1xf32>
    %c0_6 = arith.constant 0 : index
    %c0_7 = arith.constant 0 : index
    %c0_8 = arith.constant 0 : index
    %8 = vector.load %arg6[%c0_6, %c0_7, %c0_8] : memref<2x64x1xf32, #tpu.memory_space<vmem>>, vector<2x64x1xf32>
    tpu.vector_store %arg6[%c0_6, %c0_7, %c0_8], %7 {strides = array<i32>} : memref<2x64x1xf32, #tpu.memory_space<vmem>>, vector<2x64x1xf32>,
    %c0_9 = arith.constant 0 : index
    %c0_10 = arith.constant 0 : index
    %c0_11 = arith.constant 0 : index
    %9 = vector.load %arg7[%c0_9, %c0_10, %c0_11] : memref<2x64x1xf32, #tpu.memory_space<vmem>>, vector<2x64x1xf32>
    %cst_12 = arith.constant dense<0xFF800000> : vector<2x64xf32>
    %10 = vector.multi_reduction <maximumf>, %3, %cst_12 [2] : vector<2x64x256xf32> to vector<2x64xf32>
    %11 = vector.shape_cast %10 : vector<2x64xf32> to vector<2x64x1xf32>
    %12 = arith.maximumf %9, %11 : vector<2x64x1xf32>
    %c0_13 = arith.constant 0 : index
    %c0_14 = arith.constant 0 : index
    %c0_15 = arith.constant 0 : index
    %13 = vector.load %arg7[%c0_13, %c0_14, %c0_15] : memref<2x64x1xf32, #tpu.memory_space<vmem>>, vector<2x64x1xf32>
    tpu.vector_store %arg7[%c0_13, %c0_14, %c0_15], %12 {strides = array<i32>} : memref<2x64x1xf32, #tpu.memory_space<vmem>>, vector<2x64x1xf32>,
    %c0_i32_16 = arith.constant 0 : i32
    %14 = arith.cmpi eq, %arg1, %c0_i32_16 : i32
    %15 = arith.extui %14 : i1 to i32
    %c0_i32_17 = arith.constant 0 : i32
    %16 = arith.cmpi ne, %15, %c0_i32_17 : i32
    scf.if %16 {
      %c0_18 = arith.constant 0 : index
      %c0_19 = arith.constant 0 : index
      %c0_20 = arith.constant 0 : index
      %17 = vector.load %arg6[%c0_18, %c0_19, %c0_20] : memref<2x64x1xf32, #tpu.memory_space<vmem>>, vector<2x64x1xf32>
      %c0_21 = arith.constant 0 : index
      %c0_22 = arith.constant 0 : index
      %c0_23 = arith.constant 0 : index
      %18 = vector.load %arg7[%c0_21, %c0_22, %c0_23] : memref<2x64x1xf32, #tpu.memory_space<vmem>>, vector<2x64x1xf32>
      %19 = vector.shape_cast %17 : vector<2x64x1xf32> to vector<2x64xf32>
      %cst_24 = arith.constant 3.906250e-03 : f32
      %20 = vector.broadcast %cst_24 : f32 to vector<2x64xf32>
      %21 = arith.mulf %19, %20 : vector<2x64xf32>
      %22 = vector.shape_cast %18 : vector<2x64x1xf32> to vector<2x64xf32>
      %23 = tpu.concatenate %21, %22 in 0 : vector<2x64xf32>, vector<2x64xf32> -> vector<4x64xf32>
      %c0_25 = arith.constant 0 : index
      %c0_26 = arith.constant 0 : index
      %24 = vector.load %arg3[%c0_25, %c0_26] : memref<64x4xf32, #tpu.memory_space<vmem>>, vector<64x4xf32>
      %c0_27 = arith.constant 0 : index
      %c0_28 = arith.constant 0 : index
      %25 = vector.load %arg4[%c0_27, %c0_28] : memref<4x64xf32, #tpu.memory_space<vmem>>, vector<4x64xf32>
      %cst_29 = arith.constant dense<0.000000e+00> : vector<4x4xf32>
      %26 = tpu.matmul %23, %24, %cst_29 {dimension_numbers = #tpu.dot_dimension_numbers<[1], [0], [0], [1], [0, 0, 1, 1], [], []>} : vector<4x64xf32>, vector<64x4xf32>, vector<4x4xf32> -> vector<4x4xf32>
      %cst_30 = arith.constant 0.000000e+00 : f32
      %27 = vector.broadcast %cst_30 : f32 to vector<4x4xf32>
      %28 = arith.maximumf %26, %27 : vector<4x4xf32>
      %cst_31 = arith.constant dense<0.000000e+00> : vector<4x64xf32>
      %29 = tpu.matmul %28, %25, %cst_31 {dimension_numbers = #tpu.dot_dimension_numbers<[1], [0], [0], [1], [0, 0, 1, 1], [], []>} : vector<4x4xf32>, vector<4x64xf32>, vector<4x64xf32> -> vector<4x64xf32>
      %30 = vector.extract_strided_slice %29 {offsets = [0, 0], sizes = [2, 64], strides = [1, 1]} : vector<4x64xf32> to vector<2x64xf32>
      %31 = vector.extract_strided_slice %29 {offsets = [2, 0], sizes = [2, 64], strides = [1, 1]} : vector<4x64xf32> to vector<2x64xf32>
      %32 = arith.addf %30, %31 : vector<2x64xf32>
      %33 = arith.negf %32 : vector<2x64xf32>
      %34 = math.exp %33 : vector<2x64xf32>
      %cst_32 = arith.constant 1.000000e+00 : f32
      %35 = vector.broadcast %cst_32 : f32 to vector<2x64xf32>
      %36 = arith.addf %35, %34 : vector<2x64xf32>
      %37 = arith.divf %35, %36 : vector<2x64xf32>
      %38 = vector.shape_cast %37 : vector<2x64xf32> to vector<2x1x64xf32>
      %c0_33 = arith.constant 0 : index
      %c0_34 = arith.constant 0 : index
      %c0_35 = arith.constant 0 : index
      %39 = vector.load %arg5[%c0_33, %c0_34, %c0_35] : memref<2x1x64xf32, #tpu.memory_space<vmem>>, vector<2x1x64xf32>
      tpu.vector_store %arg5[%c0_33, %c0_34, %c0_35], %38 {strides = array<i32>} : memref<2x1x64xf32, #tpu.memory_space<vmem>>, vector<2x1x64xf32>,
    } else {
    }
    return
  }
  func.func @transform_0(%arg0: i32, %arg1: i32) -> (i32, i32, i32) {
    %c0_i32 = arith.constant 0 : i32
    %c0_i32_0 = arith.constant 0 : i32
    return %arg0, %c0_i32, %arg1 : i32, i32, i32
  }
  func.func @transform_1(%arg0: i32, %arg1: i32) -> (i32, i32) {
    %c0_i32 = arith.constant 0 : i32
    %c0_i32_0 = arith.constant 0 : i32
    %c0_i32_1 = arith.constant 0 : i32
    return %c0_i32, %c0_i32_0 : i32, i32
  }
  func.func @transform_2(%arg0: i32, %arg1: i32) -> (i32, i32) {
    %c0_i32 = arith.constant 0 : i32
    %c0_i32_0 = arith.constant 0 : i32
    %c0_i32_1 = arith.constant 0 : i32
    return %c0_i32, %c0_i32_0 : i32, i32
  }
  func.func @transform_3(%arg0: i32, %arg1: i32) -> (i32, i32, i32) {
    %c0_i32 = arith.constant 0 : i32
    %c0_i32_0 = arith.constant 0 : i32
    %c0_i32_1 = arith.constant 0 : i32
    return %arg0, %c0_i32, %c0_i32_0 : i32, i32, i32
  }
}

</mosaic_0001>

<bundles_post_ra>
// kernel: tpu_custom_call.1
= control target key start
LH: loop header
LB: loop body
LE: loop exit
PB: predicated region body
PF: predicated region fallthrough
CT: control target
= control target key end

     0   :  { %8 = vsyncpa [#allocation5], 0  ;;  %s945_s0 = inlined_call_operand.hbm [shape: f32[2,64,256], index: 0, kind: input, shape index: {}]   ;;  %s946_s1 = inlined_call_operand.vmem [shape: f32[64,4], index: 1, kind: input, shape index: {}]   ;;  %s947_s2 = inlined_call_operand.vmem [shape: f32[4,64], index: 2, kind: input, shape index: {}]   ;;  %s948_s3 = inlined_call_operand.hbm [shape: f32[2,1,64], index: 3, kind: output, shape index: {}]  }
   0x1   :  { %9 = vsyncpa [#allocation6], 0  ;;  %s14_s14 = sshll.u32 %s945_s0, 4  ;;  %s737_s15 = smov [#allocation4]   ;;  %s15_s14 = int_to_ptr.hbm [resolvable:$true] %s14_s14 }
   0x2   :  { %s16_s16 = sshll.u32 %s737_s15, 4  ;;  %s738_s17 = smov 256   ;;  %s17_s16 = int_to_ptr.vmem [resolvable:$true] %s16_s16 }
   0x3   :  { %s739_s18 = smov 16  }
   0x4   :  { %22 = dma.hbm_to_vmem [thread:$0]  %s15_s14, 4096, %s17_s16, [#allocation5], %s738_s17, %s738_s17, %s739_s18  }
   0x5   :  { %733 = dma.done.wait [#allocation5], 4096  }
   0x6   :  { %734 = vsyncadd [#allocation5], 4294963200  ;;  %v84_v0 = vld [vmem:[#allocation4 + $0x80] sm:$0xff]  ;;  %v85_v1 = vld [vmem:[#allocation4 + $0x88] sm:$0xff]  ;;  %vm35_vm0 = vcmask 7168   ;;  %v740_v49 = vmov 0.0  }
   0x7   :  { %v72_v2 = vld [vmem:[#allocation4 + $0x20] sm:$0xff]  ;;  %v140_v3 = vadd.f32 %v85_v1, %v84_v0  ;;  %v73_v4 = vld [vmem:[#allocation4 + $0x28] sm:$0xff]  ;;  %v86_v9 = vld [vmem:[#allocation4 + $0x90] sm:$0xff]  ;;  %v237_v25 = vmax.f32 %v84_v0, %v85_v1  ;;  %44 = vst.msk [vmem:[#allocation2 + $0x40] sm:$0xff] %vm35_vm0, %v740_v49  ;;  %v741_v1 = vmov -inf   ;;  %vm413_vm1 = vcmask 130112  }
   0x8   :  { %v68_v5 = vld [vmem:[#allocation4] sm:$0xff]  ;;  %v69_v6 = vld [vmem:[#allocation4 + $0x8] sm:$0xff]  ;;  %v122_v7 = vadd.f32 %v73_v4, %v72_v2  ;;  %v87_v10 = vld [vmem:[#allocation4 + $0x98] sm:$0xff]  ;;  %v219_v34 = vmax.f32 %v72_v2, %v73_v4  ;;  %36 = vst.msk [vmem:[#allocation2] sm:$0xff] %vm35_vm0, %v740_v49  ;;  %v742_v2 = vmov 0   ;;  %vm417_vm2 = vcmask 195712  }
   0x9   :  { %v116_v8 = vadd.f32 %v69_v6, %v68_v5  ;;  %141 = vadd.xlane.f32.xlu1 %v140_v3  ;;  %v88_v11 = vld [vmem:[#allocation4 + $0xa0] sm:$0xff]  ;;  %v89_v12 = vld [vmem:[#allocation4 + $0xa8] sm:$0xff]  ;;  %v70_v13 = vld [vmem:[#allocation4 + $0x10] sm:$0xff]  ;;  %v143_v15 = vadd.f32 %v87_v10, %v86_v9  ;;  %v213_v23 = vmax.f32 %v68_v5, %v69_v6  ;;  %v240_v27 = vmax.f32 %v86_v9, %v87_v10  ;;  %s653_s11 = sshll.u32 %s948_s3, 4  ;;  %s744_s12 = smov 1   ;;  %s654_s11 = int_to_ptr.hbm [resolvable:$true] %s653_s11 }
   0xa   :  { %123 = vadd.xlane.f32.xlu2 %v122_v7  ;;  %v71_v14 = vld [vmem:[#allocation4 + $0x18] sm:$0xff]  ;;  %v146_v16 = vadd.f32 %v89_v12, %v88_v11  ;;  %v90_v18 = vld [vmem:[#allocation4 + $0xb0] sm:$0xff]  ;;  %v92_v28 = vld [vmem:[#allocation4 + $0xc0] sm:$0xff]  ;;  %v243_v40 = vmax.f32 %v88_v11, %v89_v12  ;;  %37 = vst.msk [vmem:[#allocation2 + $0x8] sm:$0xff] %vm35_vm0, %v740_v49  ;;  %679 = vset.pattern.permute.xlu1 %v742_v2  ;;  %vm421_vm3 = vcmask 261312   ;;  %vm425_vm4 = vcmask 326912  }
   0xb   :  { %117 = vadd.xlane.f32.xlu0 %v116_v8  ;;  %v119_v17 = vadd.f32 %v71_v14, %v70_v13  ;;  %v91_v19 = vld [vmem:[#allocation4 + $0xb8] sm:$0xff]  ;;  %v74_v20 = vld [vmem:[#allocation4 + $0x30] sm:$0xff]  ;;  %v216_v26 = vmax.f32 %v70_v13, %v71_v14  ;;  %v93_v29 = vld [vmem:[#allocation4 + $0xc8] sm:$0xff]  ;;  %38 = vst.msk [vmem:[#allocation2 + $0x10] sm:$0xff] %vm35_vm0, %v740_v49  ;;  %678 = vset.pattern.permute.xlu2 %v742_v2  ;;  %vm429_vm5 = vcmask 392512   ;;  %vm433_vm6 = vcmask 458112  }
   0xc   :  { %v75_v21 = vld [vmem:[#allocation4 + $0x38] sm:$0xff]  ;;  %v149_v22 = vadd.f32 %v91_v19, %v90_v18  ;;  %v76_v30 = vld [vmem:[#allocation4 + $0x40] sm:$0xff]  ;;  %v77_v31 = vld [vmem:[#allocation4 + $0x48] sm:$0xff]  ;;  %v152_v32 = vadd.f32 %v93_v29, %v92_v28  ;;  %v246_v44 = vmax.f32 %v90_v18, %v91_v19  ;;  %v249_v51 = vmax.f32 %v92_v28, %v93_v29  ;;  %39 = vst.msk [vmem:[#allocation2 + $0x18] sm:$0xff] %vm35_vm0, %v740_v49 }
   0xd   :  { %v125_v24 = vadd.f32 %v75_v21, %v74_v20  ;;  %v128_v33 = vadd.f32 %v77_v31, %v76_v30  ;;  %v78_v35 = vld [vmem:[#allocation4 + $0x50] sm:$0xff]  ;;  %v79_v36 = vld [vmem:[#allocation4 + $0x58] sm:$0xff]  ;;  %v80_v42 = vld [vmem:[#allocation4 + $0x60] sm:$0xff]  ;;  %v222_v46 = vmax.f32 %v74_v20, %v75_v21  ;;  %v225_v50 = vmax.f32 %v76_v30, %v77_v31  ;;  %40 = vst.msk [vmem:[#allocation2 + $0x20] sm:$0xff] %vm35_vm0, %v740_v49 }
   0xe   :  { %v94_v37 = vld [vmem:[#allocation4 + $0xd0] sm:$0xff]  ;;  %v95_v38 = vld [vmem:[#allocation4 + $0xd8] sm:$0xff]  ;;  %v131_v39 = vadd.f32 %v79_v36, %v78_v35  ;;  %v81_v43 = vld [vmem:[#allocation4 + $0x68] sm:$0xff]  ;;  %41 = vst.msk [vmem:[#allocation2 + $0x28] sm:$0xff] %vm35_vm0, %v740_v49  ;;  %v228_v58 = vmax.f32 %v78_v35, %v79_v36  ;;  %680 = vset.pattern.permute.xlu0 %v742_v2  ;;  %vm437_vm7 = vcmask 523712   ;;  %vm454_vm8 = vcmask 1041409  }
   0xf   :  { %v155_v41 = vadd.f32 %v95_v38, %v94_v37  ;;  %v134_v45 = vadd.f32 %v81_v43, %v80_v42  ;;  %v96_v47 = vld [vmem:[#allocation4 + $0xe0] sm:$0xff]  ;;  %v97_v48 = vld [vmem:[#allocation4 + $0xe8] sm:$0xff]  ;;  %v98_v53 = vld [vmem:[#allocation4 + $0xf0] sm:$0xff]  ;;  %42 = vst.msk [vmem:[#allocation2 + $0x30] sm:$0xff] %vm35_vm0, %v740_v49  ;;  %v231_v60 = vmax.f32 %v80_v42, %v81_v43  ;;  %v252_v61 = vmax.f32 %v94_v37, %v95_v38 }
  0x10   :  { %v158_v52 = vadd.f32 %v97_v48, %v96_v47  ;;  %v99_v54 = vld [vmem:[#allocation4 + $0xf8] sm:$0xff]  ;;  %v82_v55 = vld [vmem:[#allocation4 + $0x70] sm:$0xff]  ;;  %43 = vst.msk [vmem:[#allocation2 + $0x38] sm:$0xff] %vm35_vm0, %v740_v49  ;;  %v255_v62 = vmax.f32 %v96_v47, %v97_v48  ;;  %v108_v3 = vld [vmem:[#allocation2 + $0x40] sm:$0xff]  ;;  %vm551_vm9 = vcmask 1043459   ;;  %vm554_vm10 = vcmask 1041408  }
  0x11   :  { %144 = vadd.xlane.f32.xlu1 %v143_v15  ;;  %v83_v56 = vld [vmem:[#allocation4 + $0x78] sm:$0xff]  ;;  %45 = vst.msk [vmem:[#allocation2 + $0x48] sm:$0xff] %vm35_vm0, %v740_v49  ;;  %v161_v57 = vadd.f32 %v99_v54, %v98_v53  ;;  %v258_v63 = vmax.f32 %v98_v53, %v99_v54  ;;  %v100_v5 = vld [vmem:[#allocation2] sm:$0xff]  ;;  %v101_v14 = vld [vmem:[#allocation2 + $0x8] sm:$0xff]  ;;  %vm565_vm11 = vcmask 523264   ;;  %vm594_vm12 = vcmask 1043456  }
  0x12   :  { %147 = vadd.xlane.f32.xlu2 %v146_v16  ;;  %46 = vst.msk [vmem:[#allocation2 + $0x50] sm:$0xff] %vm35_vm0, %v740_v49  ;;  %v137_v59 = vadd.f32 %v83_v56, %v82_v55  ;;  %v234_v0 = vmax.f32 %v82_v55, %v83_v56  ;;  %v102_v4 = vld [vmem:[#allocation2 + $0x10] sm:$0xff]  ;;  %vm590_vm13 = vcmask 31744  }
  0x13   :  { %120 = vadd.xlane.f32.xlu0 %v119_v17  ;;  %47 = vst.msk [vmem:[#allocation2 + $0x58] sm:$0xff] %vm35_vm0, %v740_v49 }
  0x14   :  { %48 = vst.msk [vmem:[#allocation2 + $0x60] sm:$0xff] %vm35_vm0, %v740_v49 }
  0x15   :  { %49 = vst.msk [vmem:[#allocation2 + $0x68] sm:$0xff] %vm35_vm0, %v740_v49 }
  0x16   :  { %50 = vst.msk [vmem:[#allocation2 + $0x70] sm:$0xff] %vm35_vm0, %v740_v49 }
  0x17   :  { %51 = vst.msk [vmem:[#allocation2 + $0x78] sm:$0xff] %vm35_vm0, %v740_v49 }
  0x18   :  { %52 = vst.msk [vmem:[#allocation3] sm:$0xff] %vm35_vm0, %v741_v1  ;;  %v109_v12 = vld [vmem:[#allocation2 + $0x48] sm:$0xff] }
  0x19   :  { %150 = vadd.xlane.f32.xlu1 %v149_v22  ;;  %53 = vst.msk [vmem:[#allocation3 + $0x8] sm:$0xff] %vm35_vm0, %v741_v1  ;;  %v110_v13 = vld [vmem:[#allocation2 + $0x50] sm:$0xff] }
  0x1a   :  { %214 = vmax.xlane.f32.xlu2 %v213_v23  ;;  %54 = vst.msk [vmem:[#allocation3 + $0x10] sm:$0xff] %vm35_vm0, %v741_v1  ;;  %v111_v21 = vld [vmem:[#allocation2 + $0x58] sm:$0xff] }
  0x1b   :  { %126 = vadd.xlane.f32.xlu0 %v125_v24  ;;  %55 = vst.msk [vmem:[#allocation3 + $0x18] sm:$0xff] %vm35_vm0, %v741_v1  ;;  %v103_v23 = vld [vmem:[#allocation2 + $0x18] sm:$0xff] }
  0x1c   :  { %56 = vst.msk [vmem:[#allocation3 + $0x20] sm:$0xff] %vm35_vm0, %v741_v1  ;;  %v113_v54 = vld [vmem:[#allocation2 + $0x68] sm:$0xff] }
  0x1d   :  { %57 = vst.msk [vmem:[#allocation3 + $0x28] sm:$0xff] %vm35_vm0, %v741_v1 }
  0x1e   :  { %58 = vst.msk [vmem:[#allocation3 + $0x30] sm:$0xff] %vm35_vm0, %v741_v1 }
  0x1f   :  { %59 = vst.msk [vmem:[#allocation3 + $0x38] sm:$0xff] %vm35_vm0, %v741_v1  ;;  %v197_v22 = vld [vmem:[#allocation3] sm:$0xff] }
  0x20   :  { %60 = vst.msk [vmem:[#allocation3 + $0x40] sm:$0xff] %vm35_vm0, %v741_v1  ;;  %v198_v31 = vld [vmem:[#allocation3 + $0x8] sm:$0xff] }
  0x21   :  { %238 = vmax.xlane.f32.xlu1 %v237_v25  ;;  %61 = vst.msk [vmem:[#allocation3 + $0x48] sm:$0xff] %vm35_vm0, %v741_v1  ;;  %v199_v42 = vld [vmem:[#allocation3 + $0x10] sm:$0xff] }
  0x22   :  { %241 = vmax.xlane.f32.xlu2 %v240_v27  ;;  %62 = vst.msk [vmem:[#allocation3 + $0x50] sm:$0xff] %vm35_vm0, %v741_v1 }
  0x23   :  { %217 = vmax.xlane.f32.xlu0 %v216_v26  ;;  %63 = vst.msk [vmem:[#allocation3 + $0x58] sm:$0xff] %vm35_vm0, %v741_v1 }
  0x24   :  { %64 = vst.msk [vmem:[#allocation3 + $0x60] sm:$0xff] %vm35_vm0, %v741_v1 }
  0x25   :  { %65 = vst.msk [vmem:[#allocation3 + $0x68] sm:$0xff] %vm35_vm0, %v741_v1 }
  0x26   :  { %66 = vst.msk [vmem:[#allocation3 + $0x70] sm:$0xff] %vm35_vm0, %v741_v1 }
  0x27   :  { %67 = vst.msk [vmem:[#allocation3 + $0x78] sm:$0xff] %vm35_vm0, %v741_v1  ;;  %v205_v30 = vld [vmem:[#allocation3 + $0x40] sm:$0xff]  ;;  %v200_v1 = vld [vmem:[#allocation3 + $0x18] sm:$0xff] }
  0x29   :  { %153 = vadd.xlane.f32.xlu1 %v152_v32  ;;  %v206_v32 = vld [vmem:[#allocation3 + $0x48] sm:$0xff] }
  0x2a   :  { %220 = vmax.xlane.f32.xlu2 %v219_v34 }
  0x2b   :  { %129 = vadd.xlane.f32.xlu0 %v128_v33 }
  0x31   :  { %132 = vadd.xlane.f32.xlu1 %v131_v39 }
  0x32   :  { %156 = vadd.xlane.f32.xlu2 %v155_v41  ;;  %v104_v41 = vld [vmem:[#allocation2 + $0x20] sm:$0xff] }
  0x33   :  { %244 = vmax.xlane.f32.xlu0 %v243_v40  ;;  %v112_v40 = vld [vmem:[#allocation2 + $0x60] sm:$0xff] }
  0x39   :  { %247 = vmax.xlane.f32.xlu1 %v246_v44 }
  0x3a   :  { %135 = vadd.xlane.f32.xlu2 %v134_v45 }
  0x3b   :  { %223 = vmax.xlane.f32.xlu0 %v222_v46 }
  0x41   :  { %226 = vmax.xlane.f32.xlu1 %v225_v50 }
  0x42   :  { %250 = vmax.xlane.f32.xlu2 %v249_v51  ;;  %v105_v51 = vld [vmem:[#allocation2 + $0x28] sm:$0xff] }
  0x43   :  { %159 = vadd.xlane.f32.xlu0 %v158_v52  ;;  %v207_v52 = vld [vmem:[#allocation3 + $0x50] sm:$0xff] }
  0x49   :  { %162 = vadd.xlane.f32.xlu1 %v161_v57 }
  0x4a   :  { %229 = vmax.xlane.f32.xlu2 %v228_v58 }
  0x4b   :  { %138 = vadd.xlane.f32.xlu0 %v137_v59 }
  0x51   :  { %232 = vmax.xlane.f32.xlu1 %v231_v60 }
  0x52   :  { %256 = vmax.xlane.f32.xlu2 %v255_v62 }
  0x53   :  { %253 = vmax.xlane.f32.xlu0 %v252_v61 }
  0x59   :  { %259 = vmax.xlane.f32.xlu1 %v258_v63  ;;  %v208_v63 = vld [vmem:[#allocation3 + $0x58] sm:$0xff] }
  0x5b   :  { %235 = vmax.xlane.f32.xlu0 %v234_v0  ;;  %v106_v0 = vld [vmem:[#allocation2 + $0x30] sm:$0xff] }
  0x7c   :  { %v142_v6 = vpop.xlane.xlu1 %141 }
  0x7d   :  { %v172_v7 = vadd.f32 %v142_v6, %v108_v3  ;;  %v124_v8 = vpop.xlane.xlu2 %123 }
  0x7e   :  { %v118_v9 = vpop.xlane.xlu0 %117  ;;  %v166_v10 = vadd.f32 %v124_v8, %v102_v4 }
  0x7f   :  { %v164_v11 = vadd.f32 %v118_v9, %v100_v5  ;;  %189 = vst.msk [vmem:[#allocation2 + $0x40] sm:$0xff] %vm35_vm0, %v172_v7 }
  0x80   :  { %183 = vst.msk [vmem:[#allocation2 + $0x10] sm:$0xff] %vm35_vm0, %v166_v10 }
  0x81   :  { %181 = vst.msk [vmem:[#allocation2] sm:$0xff] %vm35_vm0, %v164_v11 }
  0x84   :  { %v145_v15 = vpop.xlane.xlu1 %144 }
  0x85   :  { %v173_v16 = vadd.f32 %v145_v15, %v109_v12  ;;  %v148_v17 = vpop.xlane.xlu2 %147  ;;  %v209_v15 = vld [vmem:[#allocation3 + $0x60] sm:$0xff] }
  0x86   :  { %v121_v18 = vpop.xlane.xlu0 %120  ;;  %v174_v19 = vadd.f32 %v148_v17, %v110_v13  ;;  %v304_v12 = vld [vmem:[#allocation2 + $0x40] sm:$0xff] }
  0x87   :  { %v165_v20 = vadd.f32 %v121_v18, %v101_v14  ;;  %190 = vst.msk [vmem:[#allocation2 + $0x48] sm:$0xff] %vm35_vm0, %v173_v16  ;;  %v201_v13 = vld [vmem:[#allocation3 + $0x20] sm:$0xff]  ;;  %v114_v16 = vld [vmem:[#allocation2 + $0x70] sm:$0xff] }
  0x88   :  { %191 = vst.msk [vmem:[#allocation2 + $0x50] sm:$0xff] %vm35_vm0, %v174_v19  ;;  %v296_v53 = vld [vmem:[#allocation2] sm:$0xff] }
  0x89   :  { %182 = vst.msk [vmem:[#allocation2 + $0x8] sm:$0xff] %vm35_vm0, %v165_v20  ;;  %v328_v61 = vmul.f32 0.00390625, %v296_v53 }
  0x8c   :  { %v151_v24 = vpop.xlane.xlu1 %150 }
  0x8d   :  { %v175_v25 = vadd.f32 %v151_v24, %v111_v21  ;;  %v215_v26 = vpop.xlane.xlu2 %214 }
  0x8e   :  { %v127_v27 = vpop.xlane.xlu0 %126  ;;  %v261_v28 = vmax.f32 %v197_v22, %v215_v26  ;;  %v305_v2 = vld [vmem:[#allocation2 + $0x48] sm:$0xff]  ;;  %v336_v22 = vmul.f32 0.00390625, %v304_v12 }
  0x8f   :  { %v167_v29 = vadd.f32 %v127_v27, %v103_v23  ;;  %192 = vst.msk [vmem:[#allocation2 + $0x58] sm:$0xff] %vm35_vm0, %v175_v25  ;;  %v337_v11 = vmul.f32 0.00390625, %v305_v2  ;;  %v306_v17 = vld [vmem:[#allocation2 + $0x50] sm:$0xff] }
  0x90   :  { %277 = vst.msk [vmem:[#allocation3] sm:$0xff] %vm35_vm0, %v261_v28  ;;  %v297_v14 = vld [vmem:[#allocation2 + $0x8] sm:$0xff]  ;;  %v338_v26 = vmul.f32 0.00390625, %v306_v17  ;;  %v298_v27 = vld [vmem:[#allocation2 + $0x10] sm:$0xff]  ;;  %v115_v28 = vld [vmem:[#allocation2 + $0x78] sm:$0xff] }
  0x91   :  { %184 = vst.msk [vmem:[#allocation2 + $0x18] sm:$0xff] %vm35_vm0, %v167_v29  ;;  %v329_v23 = vmul.f32 0.00390625, %v297_v14 }
  0x94   :  { %v239_v33 = vpop.xlane.xlu1 %238 }
  0x95   :  { %v269_v34 = vmax.f32 %v205_v30, %v239_v33  ;;  %v242_v36 = vpop.xlane.xlu2 %241  ;;  %v202_v30 = vld [vmem:[#allocation3 + $0x28] sm:$0xff] }
  0x96   :  { %v218_v35 = vpop.xlane.xlu0 %217  ;;  %v270_v38 = vmax.f32 %v206_v32, %v242_v36  ;;  %v307_v29 = vld [vmem:[#allocation2 + $0x58] sm:$0xff] }
  0x97   :  { %v262_v37 = vmax.f32 %v198_v31, %v218_v35  ;;  %285 = vst.msk [vmem:[#allocation3 + $0x40] sm:$0xff] %vm35_vm0, %v269_v34  ;;  %v312_v39 = vld [vmem:[#allocation3] sm:$0xff]  ;;  %v107_v31 = vld [vmem:[#allocation2 + $0x38] sm:$0xff] }
  0x98   :  { %474 = vperm.xlu2 %678, %v312_v39   ;;  %286 = vst.msk [vmem:[#allocation3 + $0x48] sm:$0xff] %vm35_vm0, %v270_v38  ;;  %v299_v32 = vld [vmem:[#allocation2 + $0x18] sm:$0xff]  ;;  %v330_v38 = vmul.f32 0.00390625, %v298_v27 }
  0x99   :  { %278 = vst.msk [vmem:[#allocation3 + $0x8] sm:$0xff] %vm35_vm0, %v262_v37  ;;  %v339_v37 = vmul.f32 0.00390625, %v307_v29 }
  0x9c   :  { %v154_v43 = vpop.xlane.xlu1 %153 }
  0x9d   :  { %v221_v45 = vpop.xlane.xlu2 %220  ;;  %v176_v46 = vadd.f32 %v154_v43, %v112_v40 }
  0x9e   :  { %v130_v44 = vpop.xlane.xlu0 %129  ;;  %v320_v48 = vld [vmem:[#allocation3 + $0x40] sm:$0xff]  ;;  %v263_v49 = vmax.f32 %v199_v42, %v221_v45  ;;  %v203_v42 = vld [vmem:[#allocation3 + $0x30] sm:$0xff] }
  0x9f   :  { %v168_v47 = vadd.f32 %v130_v44, %v104_v41  ;;  %193 = vst.msk [vmem:[#allocation2 + $0x60] sm:$0xff] %vm35_vm0, %v176_v46  ;;  %v321_v57 = vld [vmem:[#allocation3 + $0x48] sm:$0xff]  ;;  %v331_v41 = vmul.f32 0.00390625, %v299_v32  ;;  %v211_v45 = vld [vmem:[#allocation3 + $0x70] sm:$0xff] }
  0xa0   :  { %v313_v50 = vld [vmem:[#allocation3 + $0x8] sm:$0xff]  ;;  %498 = vperm.xlu2 %678, %v320_v48   ;;  %279 = vst.msk [vmem:[#allocation3 + $0x10] sm:$0xff] %vm35_vm0, %v263_v49 }
  0xa1   :  { %185 = vst.msk [vmem:[#allocation2 + $0x20] sm:$0xff] %vm35_vm0, %v168_v47  ;;  %477 = vperm.xlu1 %679, %v313_v50   ;;  %v210_v44 = vld [vmem:[#allocation3 + $0x68] sm:$0xff] }
  0xa4   :  { %v133_v55 = vpop.xlane.xlu1 %132 }
  0xa5   :  { %v169_v58 = vadd.f32 %v133_v55, %v105_v51  ;;  %v157_v59 = vpop.xlane.xlu2 %156  ;;  %v212_v55 = vld [vmem:[#allocation3 + $0x78] sm:$0xff] }
  0xa6   :  { %v245_v56 = vpop.xlane.xlu0 %244  ;;  %v177_v62 = vadd.f32 %v157_v59, %v113_v54 }
  0xa7   :  { %v271_v60 = vmax.f32 %v207_v52, %v245_v56  ;;  %186 = vst.msk [vmem:[#allocation2 + $0x28] sm:$0xff] %vm35_vm0, %v169_v58  ;;  %v314_v4 = vld [vmem:[#allocation3 + $0x10] sm:$0xff]  ;;  %v308_v56 = vld [vmem:[#allocation2 + $0x60] sm:$0xff] }
  0xa8   :  { %361 = vperm.xlu2 %678, %v328_v61   ;;  %194 = vst.msk [vmem:[#allocation2 + $0x68] sm:$0xff] %vm35_vm0, %v177_v62  ;;  %v300_v43 = vld [vmem:[#allocation2 + $0x20] sm:$0xff]  ;;  %v340_v62 = vmul.f32 0.00390625, %v308_v56 }
  0xa9   :  { %287 = vst.msk [vmem:[#allocation3 + $0x50] sm:$0xff] %vm35_vm0, %v271_v60  ;;  %501 = vperm.xlu1 %679, %v321_v57   ;;  %v332_v51 = vmul.f32 0.00390625, %v300_v43  ;;  %v204_v57 = vld [vmem:[#allocation3 + $0x38] sm:$0xff]  ;;  %v556_v56 = vld [vmem:[%s946_s1] sm:$0xff] }
  0xaa   :  { %v563_v43 = vld [vmem:[%s946_s1 + $0x38] sm:$0xff] }
  0xab   :  { %577 = vmatpush.msra.mxu0 %v563_v43 }
  0xac   :  { %v248_v3 = vpop.xlane.xlu1 %247 }
  0xad   :  { %v272_v5 = vmax.f32 %v208_v63, %v248_v3  ;;  %v136_v6 = vpop.xlane.xlu2 %135 }
  0xae   :  { %v224_v7 = vpop.xlane.xlu0 %223  ;;  %v170_v8 = vadd.f32 %v136_v6, %v106_v0 }
  0xaf   :  { %v264_v9 = vmax.f32 %v200_v1, %v224_v7  ;;  %288 = vst.msk [vmem:[#allocation3 + $0x58] sm:$0xff] %vm35_vm0, %v272_v5  ;;  %v301_v1 = vld [vmem:[#allocation2 + $0x28] sm:$0xff] }
  0xb0   :  { %v322_v10 = vld [vmem:[#allocation3 + $0x50] sm:$0xff]  ;;  %187 = vst.msk [vmem:[#allocation2 + $0x30] sm:$0xff] %vm35_vm0, %v170_v8  ;;  %388 = vperm.xlu2 %678, %v337_v11   ;;  %v309_v2 = vld [vmem:[#allocation2 + $0x68] sm:$0xff] }
  0xb1   :  { %504 = vperm.xlu0 %680, %v322_v10   ;;  %480 = vperm.xlu1 %679, %v314_v4   ;;  %280 = vst.msk [vmem:[#allocation3 + $0x18] sm:$0xff] %vm35_vm0, %v264_v9  ;;  %v333_v4 = vmul.f32 0.00390625, %v301_v1  ;;  %v341_v5 = vmul.f32 0.00390625, %v309_v2 }
  0xb4   :  { %v227_v18 = vpop.xlane.xlu1 %226 }
  0xb5   :  { %v265_v19 = vmax.f32 %v201_v13, %v227_v18  ;;  %v251_v20 = vpop.xlane.xlu2 %250 }
  0xb6   :  { %v160_v21 = vpop.xlane.xlu0 %159  ;;  %v273_v24 = vmax.f32 %v209_v15, %v251_v20  ;;  %v323_v52 = vld [vmem:[#allocation3 + $0x58] sm:$0xff] }
  0xb7   :  { %v178_v25 = vadd.f32 %v160_v21, %v114_v16  ;;  %281 = vst.msk [vmem:[#allocation3 + $0x20] sm:$0xff] %vm35_vm0, %v265_v19  ;;  %v302_v7 = vld [vmem:[#allocation2 + $0x30] sm:$0xff] }
  0xb8   :  { %289 = vst.msk [vmem:[#allocation3 + $0x60] sm:$0xff] %vm35_vm0, %v273_v24  ;;  %391 = vperm.xlu2 %678, %v338_v26   ;;  %v315_v47 = vld [vmem:[#allocation3 + $0x18] sm:$0xff]  ;;  %v334_v10 = vmul.f32 0.00390625, %v302_v7 }
  0xb9   :  { %385 = vperm.xlu1 %679, %v336_v22   ;;  %364 = vperm.xlu0 %680, %v329_v23   ;;  %195 = vst.msk [vmem:[#allocation2 + $0x70] sm:$0xff] %vm35_vm0, %v178_v25  ;;  %v408_v22 = vlaneseq }
  0xbb   :  { %v835_v23 = vand.u32 127, %v408_v22 }
  0xbc   :  { %v163_v33 = vpop.xlane.xlu1 %162 }
  0xbd   :  { %v230_v34 = vpop.xlane.xlu2 %229  ;;  %v179_v36 = vadd.f32 %v163_v33, %v115_v28  ;;  %v840_v25 = vadd.s32 4294967288, %v835_v23 }
  0xbe   :  { %v139_v35 = vpop.xlane.xlu0 %138  ;;  %v266_v39 = vmax.f32 %v202_v30, %v230_v34  ;;  %v316_v63 = vld [vmem:[#allocation3 + $0x20] sm:$0xff] }
  0xbf   :  { %v171_v40 = vadd.f32 %v139_v35, %v107_v31  ;;  %196 = vst.msk [vmem:[#allocation2 + $0x78] sm:$0xff] %vm35_vm0, %v179_v36  ;;  %v324_v59 = vld [vmem:[#allocation3 + $0x60] sm:$0xff] }
  0xc0   :  { %282 = vst.msk [vmem:[#allocation3 + $0x28] sm:$0xff] %vm35_vm0, %v266_v39  ;;  %370 = vperm.xlu2 %678, %v331_v41   ;;  %v310_v6 = vld [vmem:[#allocation2 + $0x70] sm:$0xff] }
  0xc1   :  { %394 = vperm.xlu1 %679, %v339_v37   ;;  %367 = vperm.xlu0 %680, %v330_v38   ;;  %188 = vst.msk [vmem:[#allocation2 + $0x38] sm:$0xff] %vm35_vm0, %v171_v40  ;;  %v342_v9 = vmul.f32 0.00390625, %v310_v6 }
  0xc4   :  { %v233_v46 = vpop.xlane.xlu1 %232 }
  0xc5   :  { %v267_v49 = vmax.f32 %v203_v42, %v233_v46  ;;  %v257_v50 = vpop.xlane.xlu2 %256 }
  0xc6   :  { %v254_v48 = vpop.xlane.xlu0 %253  ;;  %v275_v54 = vmax.f32 %v211_v45, %v257_v50  ;;  %v311_v15 = vld [vmem:[#allocation2 + $0x78] sm:$0xff] }
  0xc7   :  { %v274_v53 = vmax.f32 %v210_v44, %v254_v48  ;;  %283 = vst.msk [vmem:[#allocation3 + $0x30] sm:$0xff] %vm35_vm0, %v267_v49  ;;  %v317_v3 = vld [vmem:[#allocation3 + $0x28] sm:$0xff]  ;;  %v343_v17 = vmul.f32 0.00390625, %v311_v15  ;;  %v560_v49 = vld [vmem:[%s946_s1 + $0x20] sm:$0xff]  ;;  %v559_v50 = vld [vmem:[%s946_s1 + $0x18] sm:$0xff] }
  0xc8   :  { %507 = vperm.xlu2 %678, %v323_v52   ;;  %291 = vst.msk [vmem:[#allocation3 + $0x70] sm:$0xff] %vm35_vm0, %v275_v54  ;;  %v303_v11 = vld [vmem:[#allocation2 + $0x38] sm:$0xff]  ;;  %v561_v48 = vld [vmem:[%s946_s1 + $0x28] sm:$0xff]  ;;  %v558_v54 = vld [vmem:[%s946_s1 + $0x10] sm:$0xff] }
  0xc9   :  { %373 = vperm.xlu1 %679, %v332_v51   ;;  %483 = vperm.xlu0 %680, %v315_v47   ;;  %290 = vst.msk [vmem:[#allocation3 + $0x68] sm:$0xff] %vm35_vm0, %v274_v53  ;;  %v335_v13 = vmul.f32 0.00390625, %v303_v11  ;;  %v562_v47 = vld [vmem:[%s946_s1 + $0x30] sm:$0xff] }
  0xca   :  { %578 = vmatpush.msra.mxu0 %v562_v47 }
  0xcc   :  { %v260_v58 = vpop.xlane.xlu1 %259  ;;  %579 = vmatpush.msra.mxu0 %v561_v48 }
  0xcd   :  { %v276_v60 = vmax.f32 %v212_v55, %v260_v58  ;;  %v557_v55 = vld [vmem:[%s946_s1 + $0x8] sm:$0xff] }
  0xce   :  { %v236_v61 = vpop.xlane.xlu0 %235  ;;  %v318_v12 = vld [vmem:[#allocation3 + $0x30] sm:$0xff]  ;;  %580 = vmatpush.msra.mxu0 %v560_v49 }
  0xcf   :  { %v268_v0 = vmax.f32 %v204_v57, %v236_v61  ;;  %292 = vst.msk [vmem:[#allocation3 + $0x78] sm:$0xff] %vm35_vm0, %v276_v60  ;;  %v326_v14 = vld [vmem:[#allocation3 + $0x70] sm:$0xff]  ;;  %v415_v60 = vadd.s32 4294967280, %v835_v23 }
  0xd0   :  { %486 = vperm.xlu2 %678, %v316_v63   ;;  %v325_v8 = vld [vmem:[#allocation3 + $0x68] sm:$0xff]  ;;  %581 = vmatpush.msra.mxu0 %v559_v50 }
  0xd1   :  { %510 = vperm.xlu1 %679, %v324_v59   ;;  %397 = vperm.xlu0 %680, %v340_v62   ;;  %284 = vst.msk [vmem:[#allocation3 + $0x38] sm:$0xff] %vm35_vm0, %v268_v0  ;;  %v419_v0 = vadd.s32 4294967272, %v835_v23 }
  0xd2   :  { %582 = vmatpush.msra.mxu0 %v558_v54 }
  0xd4   :  { %583 = vmatpush.msra.mxu0 %v557_v55 }
  0xd6   :  { %v327_v16 = vld [vmem:[#allocation3 + $0x78] sm:$0xff]  ;;  %584 = vmatpush.msra.mxu0 %v556_v56 }
  0xd8   :  { %400 = vperm.xlu2 %678, %v341_v5   ;;  %v319_v18 = vld [vmem:[#allocation3 + $0x38] sm:$0xff] }
  0xd9   :  { %489 = vperm.xlu1 %679, %v317_v3   ;;  %376 = vperm.xlu0 %680, %v333_v4  }
  0xe0   :  { %379 = vperm.xlu2 %678, %v334_v10  }
  0xe1   :  { %403 = vperm.xlu1 %679, %v342_v9   ;;  %513 = vperm.xlu0 %680, %v325_v8   ;;  %v423_v9 = vadd.s32 4294967264, %v835_v23 }
  0xe8   :  { %516 = vperm.xlu2 %678, %v326_v14  }
  0xe9   :  { %382 = vperm.xlu1 %679, %v335_v13   ;;  %492 = vperm.xlu0 %680, %v318_v12   ;;  %v427_v12 = vadd.s32 4294967256, %v835_v23  ;;  %v431_v13 = vadd.s32 4294967248, %v835_v23 }
  0xf0   :  { %495 = vperm.xlu2 %678, %v319_v18  }
  0xf1   :  { %519 = vperm.xlu1 %679, %v327_v16   ;;  %406 = vperm.xlu0 %680, %v343_v17  }
  0xf2   :  { %v475_v19 = vpop.permute.xlu2 %474 }
  0xf3   :  { %v521_v27 = vperm.slane %v475_v19, %v835_v23 }
  0xfa   :  { %v499_v20 = vpop.permute.xlu2 %498 }
  0xfb   :  { %v536_v32 = vperm.slane %v499_v20, %v835_v23 }
 0x102   :  { %v833_v21 = vpop.permute.xlu2 %361 }
 0x103   :  { %v410_v3 = vperm.slane %v833_v21, %v835_v23 }
 0x10a   :  { %v837_v24 = vpop.permute.xlu2 %388 }
 0x10b   :  { %v440_v7 = vperm.slane %v837_v24, %v840_v25 }
 0x112   :  { %v845_v30 = vpop.permute.xlu2 %391 }
 0x113   :  { %v478_v26 = vpop.permute.xlu1 %477  ;;  %v442_v11 = vperm.slane %v845_v30, %v415_v60 }
 0x114   :  { %v522_v28 = vperm.slane %v478_v26, %v840_v25 }
 0x116   :  { %v523_v29 = vsel %vm413_vm1, %v522_v28, %v521_v27  ;;  %v435_v27 = vadd.s32 4294967240, %v835_v23 }
 0x11a   :  { %v850_v37 = vpop.permute.xlu2 %370 }
 0x11b   :  { %v502_v31 = vpop.permute.xlu1 %501  ;;  %v420_v14 = vperm.slane %v850_v37, %v419_v0 }
 0x11c   :  { %v537_v33 = vperm.slane %v502_v31, %v840_v25 }
 0x11e   :  { %v538_v34 = vsel %vm413_vm1, %v537_v33, %v536_v32 }
 0x122   :  { %v508_v40 = vpop.permute.xlu2 %507 }
 0x123   :  { %v505_v35 = vpop.permute.xlu0 %504  ;;  %v481_v36 = vpop.permute.xlu1 %480  ;;  %v541_v4 = vperm.slane %v508_v40, %v419_v0 }
 0x124   :  { %v539_v63 = vperm.slane %v505_v35, %v415_v60  ;;  %v524_v1 = vperm.slane %v481_v36, %v415_v60 }
 0x126   :  { %v540_v8 = vsel %vm417_vm2, %v539_v63, %v538_v34  ;;  %v525_v15 = vsel %vm417_vm2, %v524_v1, %v523_v29 }
 0x127   :  { %v542_v18 = vsel %vm421_vm3, %v541_v4, %v540_v8 }
 0x12a   :  { %v857_v44 = vpop.permute.xlu2 %486 }
 0x12b   :  { %v386_v38 = vpop.permute.xlu1 %385  ;;  %v365_v39 = vpop.permute.xlu0 %364  ;;  %v528_v28 = vperm.slane %v857_v44, %v423_v9 }
 0x12c   :  { %v439_v2 = vperm.slane %v386_v38, %v835_v23  ;;  %v412_v5 = vperm.slane %v365_v39, %v840_v25 }
 0x12e   :  { %v441_v16 = vsel %vm413_vm1, %v440_v7, %v439_v2  ;;  %v414_v19 = vsel %vm413_vm1, %v412_v5, %v410_v3  ;;  %v564_v3 = vld [vmem:[%s947_s2] sm:$0xf]  ;;  %s743_s2 = smov [#allocation7]   ;;  %vm644_vm1 = vcmask 516096  }
 0x12f   :  { %v443_v29 = vsel %vm417_vm2, %v442_v11, %v441_v16  ;;  %667 = vmatpush.msk.msra.mxu1 %vm594_vm12, %v564_v3  ;;  %s651_s8 = sshll.u32 %s743_s2, 4  ;;  %s652_s8 = int_to_ptr.vmem [resolvable:$true] %s651_s8 }
 0x132   :  { %v873_v51 = vpop.permute.xlu2 %400 }
 0x133   :  { %v852_v41 = vpop.permute.xlu1 %394  ;;  %v368_v42 = vpop.permute.xlu0 %367  ;;  %v448_v36 = vperm.slane %v873_v51, %v427_v12 }
 0x134   :  { %v416_v10 = vperm.slane %v368_v42, %v415_v60  ;;  %v444_v20 = vperm.slane %v852_v41, %v419_v0 }
 0x136   :  { %v418_v24 = vsel %vm417_vm2, %v416_v10, %v414_v19  ;;  %v445_v35 = vsel %vm421_vm3, %v444_v20, %v443_v29 }
 0x137   :  { %v422_v37 = vsel %vm421_vm3, %v420_v14, %v418_v24 }
 0x13a   :  { %v886_v59 = vpop.permute.xlu2 %379 }
 0x13b   :  { %v859_v45 = vpop.permute.xlu1 %373  ;;  %v484_v46 = vpop.permute.xlu0 %483  ;;  %v432_v39 = vperm.slane %v886_v59, %v431_v13 }
 0x13c   :  { %v526_v17 = vperm.slane %v484_v46, %v419_v0  ;;  %v424_v25 = vperm.slane %v859_v45, %v423_v9 }
 0x13e   :  { %v527_v31 = vsel %vm421_vm3, %v526_v17, %v525_v15  ;;  %v426_v23 = vsel %vm425_vm4, %v424_v25, %v422_v37 }
 0x13f   :  { %v529_v43 = vsel %vm425_vm4, %v528_v28, %v527_v31 }
 0x142   :  { %v517_v6 = vpop.permute.xlu2 %516 }
 0x143   :  { %v875_v52 = vpop.permute.xlu1 %510  ;;  %v398_v53 = vpop.permute.xlu0 %397  ;;  %v547_v42 = vperm.slane %v517_v6, %v431_v13 }
 0x144   :  { %v446_v26 = vperm.slane %v398_v53, %v423_v9  ;;  %v543_v30 = vperm.slane %v875_v52, %v423_v9 }
 0x146   :  { %v447_v40 = vsel %vm425_vm4, %v446_v26, %v445_v35  ;;  %v544_v41 = vsel %vm425_vm4, %v543_v30, %v542_v18 }
 0x147   :  { %v449_v50 = vsel %vm429_vm5, %v448_v36, %v447_v40 }
 0x14a   :  { %v496_v44 = vpop.permute.xlu2 %495 }
 0x14b   :  { %v490_v57 = vpop.permute.xlu1 %489  ;;  %v377_v58 = vpop.permute.xlu0 %376  ;;  %v534_v54 = vperm.slane %v496_v44, %v435_v27 }
 0x14c   :  { %v530_v32 = vperm.slane %v490_v57, %v427_v12  ;;  %v428_v33 = vperm.slane %v377_v58, %v427_v12 }
 0x14e   :  { %v531_v46 = vsel %vm429_vm5, %v530_v32, %v529_v43  ;;  %v430_v47 = vsel %vm429_vm5, %v428_v33, %v426_v23 }
 0x14f   :  { %v434_v58 = vsel %vm433_vm6, %v432_v39, %v430_v47 }
 0x153   :  { %v889_v61 = vpop.permute.xlu1 %403  ;;  %v514_v62 = vpop.permute.xlu0 %513 }
 0x154   :  { %v545_v34 = vperm.slane %v514_v62, %v427_v12  ;;  %v450_v45 = vperm.slane %v889_v61, %v431_v13 }
 0x156   :  { %v546_v48 = vsel %vm429_vm5, %v545_v34, %v544_v41  ;;  %v451_v57 = vsel %vm433_vm6, %v450_v45, %v449_v50 }
 0x157   :  { %v548_v59 = vsel %vm433_vm6, %v547_v42, %v546_v48 }
 0x15b   :  { %v383_v21 = vpop.permute.xlu1 %382  ;;  %v493_v22 = vpop.permute.xlu0 %492 }
 0x15c   :  { %v532_v38 = vperm.slane %v493_v22, %v431_v13  ;;  %v436_v49 = vperm.slane %v383_v21, %v435_v27 }
 0x15e   :  { %v533_v51 = vsel %vm433_vm6, %v532_v38, %v531_v46  ;;  %v438_v60 = vsel %vm437_vm7, %v436_v49, %v434_v58 }
 0x15f   :  { %v535_v63 = vsel %vm437_vm7, %v534_v54, %v533_v51 }
 0x163   :  { %v520_v52 = vpop.permute.xlu1 %519  ;;  %v407_v53 = vpop.permute.xlu0 %406 }
 0x164   :  { %v549_v55 = vperm.slane %v520_v52, %v435_v27  ;;  %v452_v56 = vperm.slane %v407_v53, %v435_v27 }
 0x166   :  { %v550_v61 = vsel %vm437_vm7, %v549_v55, %v548_v59  ;;  %v453_v62 = vsel %vm437_vm7, %v452_v56, %v451_v57 }
 0x167   :  { %v455_v0 = vsel %vm454_vm8, %v453_v62, %v438_v60  ;;  %v552_v1 = vsel %vm551_vm9, %v550_v61, %v535_v63 }
 0x168   :  { %v555_v2 = vsel %vm554_vm10, %v455_v0, %v552_v1 }
 0x169   :  { %666 = vmatmul.msk.f32.vlgmr.msra.gmra.mxu0 %vm565_vm11, %v555_v2 }
 0x1e6   :  { %v586_v4 = vpop.f32.mrf.mxu0 }
 0x1e7   :  { %v589_v5 = vmax.f32 %v586_v4, 0.0 }
 0x1e9   :  { %668 = vmatmul.msk.f32.vlgmr.msra.gmra.mxu1 %vm590_vm13, %v589_v5 }
 0x266   :  { %v615_v6 = vpop.f32.mrf.mxu1 }
 0x267   :  { %v619_v7 = vrot.slane %v615_v6, 2 }
 0x269   :  { %v621_v8 = vadd.f32 %v619_v7, %v615_v6 }
 0x26b   :  { %v669_v9 = vmul.f32 -1.442695, %v621_v8 }
 0x26d   :  { %681 = vpow2.f32 %v669_v9 }
 0x273   :  { %v682_v10 = vpop.eup %681 }
 0x274   :  { %v625_v11 = vadd.f32 1.0, %v682_v10 }
 0x276   :  { %683 = vrcp.f32 %v625_v11  ;;  %v637_v15 = vand.u32 2147483648, %v625_v11  ;;  %v635_v17 = vand.u32 2147483647, %v625_v11  ;;  %vm631_vm15 = vweird.f32 %v625_v11 }
 0x278   :  { %v638_v19 = vor.u32 1.1754944e-38, %v637_v15  ;;  %vm636_vm2 = vcmp.eq.f32.partialorder %v635_v17, 8.507059e+37 }
 0x27c   :  { %v684_v12 = vpop.eup %683 }
 0x27d   :  { %v627_v13 = vmul.f32 %v684_v12, %v625_v11  ;;  %vm632_vm14 = vweird.f32 %v684_v12 }
 0x27e   :  { %vm633_vm0 = vmor %vm631_vm15, %vm632_vm14 }
 0x27f   :  { %v628_v14 = vsub.f32 1.0, %v627_v13 }
 0x281   :  { %v629_v16 = vmul.f32 %v684_v12, %v628_v14 }
 0x283   :  { %v630_v18 = vadd.f32 %v684_v12, %v629_v16 }
 0x285   :  { %v634_v20 = vsel %vm633_vm0, %v684_v12, %v630_v18 }
 0x286   :  { %v639_v21 = vsel %vm636_vm2, %v638_v19, %v634_v20 }
 0x287   :  { %v642_v22 = vrot.slane %v639_v21, 1  ;;  %645 = vst.msk [vmem:[#allocation7] sm:$0x1] %vm644_vm1, %v639_v21 }
 0x289   :  { %646 = vst.msk [vmem:[#allocation7 + $0x1] sm:$0x1] %vm644_vm1, %v642_v22 }
 0x28a   :  { %659 = dma.vmem_to_hbm [thread:$0]  %s652_s8, 32, %s654_s11, [#allocation6], %s739_s18, %s739_s18, %s744_s12  }
 0x28b   :  { %735 = dma.done.wait [#allocation6], 32  }
 0x28c   :  { %736 = vsyncadd [#allocation6], 4294967264 }
 0x28d   :  { %664 = vsyncpa [#allocation5], 1 }
 0x28e   :  { %665 = vsyncpa [#allocation6], 1 }

</bundles_post_ra>
